<compile_context>
chip_gen: v7x
topology: tpu7x:2x2x1
jax: 0.10.0
libtpu: 0.0.40
codegen_flags: <defaults>
</compile_context>

<pallas_src>
import functools

import jax
import jax.numpy as jnp
from jax.experimental import pallas as pl
from jax.experimental.pallas import tpu as pltpu


def _make_kernel(in_f: int, hid: int, out_f: int):
    """Fused MLP kernel for static (in_f, hid, out_f).

    Refs (all f32):
      b2_ref : (out_f,)      SMEM   output bias (scalars)
      w1t_ref: (hid, in_f)   VMEM   hidden weights, column-major per input feature
      b1c_ref: (hid, 1)      VMEM   hidden bias column
      w2_ref : (hid, out_f)  VMEM   output weights
      x_ref  : (in_f, B)     VMEM   batch on lanes
      o_ref  : (out_f, B)    VMEM   batch on lanes
    """

    def mlp_kernel(b2_ref, w1t_ref, b1c_ref, w2_ref, x_ref, o_ref):
        x = x_ref[...]                                   # (in_f, B)
        B = x.shape[1]

        # Hidden layer, fully vectorized over sublanes: (hid, B) pre-activation.
        acc = jnp.broadcast_to(b1c_ref[...], (hid, B))   # bias, hoisted once
        for i in range(in_f):                            # in_f == 1 here
            acc = acc + w1t_ref[:, i:i + 1] * x[i:i + 1, :]
        h = jnp.maximum(acc, 0.0)                        # (hid, B), one vreg slab

        # Output layer: K=hid contraction as a cross-sublane reduce (XLU slot),
        # one reduce + one bias add per output feature (out_f == 1 here).
        for o in range(out_f):
            y = jnp.sum(h * w2_ref[:, o:o + 1], axis=0, keepdims=True) + b2_ref[o]
            o_ref[o:o + 1, :] = y                        # full-width lane-dense store

    return mlp_kernel


def make_est_model_forward(w1, b1, w2, b2):
    """Builds a jit-compiled forward pass with parameters staged once.

    w1: (in_f, hid)   b1: (hid,)   w2: (hid, out_f)   b2: (out_f,)
    (These are the transposes of PyTorch nn.Linear's (out, in) weight layout.)
    Returned fn maps x:(B, in_f) -> (B, out_f) == relu(x @ w1 + b1) @ w2 + b2.
    """
    in_f, hid = w1.shape
    out_f = w2.shape[1]

    # One-time parameter staging: no concat / transpose HLOs per call.
    w1t = jnp.asarray(w1, jnp.float32).T.reshape(hid, in_f)   # (hid, in_f)
    b1c = jnp.asarray(b1, jnp.float32).reshape(hid, 1)        # (hid, 1)
    w2c = jnp.asarray(w2, jnp.float32).reshape(hid, out_f)    # (hid, out_f)
    b2f = jnp.asarray(b2, jnp.float32).reshape(out_f)         # (out_f,) -> SMEM

    kernel = _make_kernel(in_f, hid, out_f)

    @jax.jit
    def forward(x):
        B = x.shape[0]

        # in_f == 1: (B,1) and (1,B) hold identical data -> reshape (no transpose HLO).
        if in_f == 1:
            x_t = x.astype(jnp.float32).reshape(1, B)
        else:
            # TODO(synk): for in_f > 1, fold this transpose into a BlockSpec
            # index_map instead of emitting a separate XLA transpose.
            x_t = x.astype(jnp.float32).T

        out_t = pl.pallas_call(
            kernel,
            out_shape=jax.ShapeDtypeStruct((out_f, B), jnp.float32),
            in_specs=[
                pl.BlockSpec(memory_space=pltpu.MemorySpace.SMEM),  # b2
                pl.BlockSpec(memory_space=pltpu.MemorySpace.VMEM),  # w1t
                pl.BlockSpec(memory_space=pltpu.MemorySpace.VMEM),  # b1c
                pl.BlockSpec(memory_space=pltpu.MemorySpace.VMEM),  # w2
                pl.BlockSpec(memory_space=pltpu.MemorySpace.VMEM),  # x (in_f, B)
            ],
            out_specs=pl.BlockSpec(memory_space=pltpu.MemorySpace.VMEM),
        )(b2f, w1t, b1c, w2c, x_t)

        if out_f == 1:
            return out_t.reshape(B, out_f).astype(x.dtype)
        return out_t.T.astype(x.dtype)

    return forward

# TODO(synk): if batch grows very large (>~100K), add a 1-D "parallel" grid over
# lane-dense batch tiles (params stay resident) so v7x's second TensorCore is
# used and tiles respect per-chip scoped-VMEM defaults (16/32/32 MiB).


def reference_forward(x, w1, b1, w2, b2):
    h = jnp.maximum(x @ w1 + b1, 0.0)
    return h @ w2 + b2


if __name__ == "__main__":
    input_size, hidden_size, output_size = 1, 8, 1
    batch = 128  # one full lane-width of batch elements per vreg row

    key = jax.random.PRNGKey(0)
    kx, kw1, kb1, kw2, kb2 = jax.random.split(key, 5)

    # Parameters stored pre-transposed as (in, out) relative to PyTorch's (out, in).
    w1 = jax.random.normal(kw1, (input_size, hidden_size), jnp.float32) * 0.5
    b1 = jax.random.normal(kb1, (hidden_size,), jnp.float32) * 0.1
    w2 = jax.random.normal(kw2, (hidden_size, output_size), jnp.float32) * 0.5
    b2 = jax.random.normal(kb2, (output_size,), jnp.float32) * 0.1

    x = jax.random.normal(kx, (batch, input_size), jnp.float32)

    forward = make_est_model_forward(w1, b1, w2, b2)
    out = jax.block_until_ready(forward(x))

    ref = reference_forward(x, w1, b1, w2, b2)
    assert out.shape == (batch, output_size)
    assert jnp.allclose(out, ref, atol=1e-5, rtol=1e-5)

    print("KERNEL_OK")
</pallas_src>

<mosaic_0001>
module attributes {stable_mosaic.version = 11 : i64} {
  func.func @mlp_kernel(%arg0: memref<1xf32, #tpu.memory_space<smem>>, %arg1: memref<8x1xf32, #tpu.memory_space<vmem>>, %arg2: memref<8x1xf32, #tpu.memory_space<vmem>>, %arg3: memref<8x1xf32, #tpu.memory_space<vmem>>, %arg4: memref<1x128xf32, #tpu.memory_space<vmem>>, %arg5: memref<1x128xf32, #tpu.memory_space<vmem>>) attributes {dimension_semantics = [], scalar_prefetch = 0 : i64, scratch_operands = 0 : i64, tpu.core_type = #tpu.core_type<tc>} {
    %c0 = arith.constant 0 : index
    %c0_0 = arith.constant 0 : index
    %0 = vector.load %arg4[%c0, %c0_0] : memref<1x128xf32, #tpu.memory_space<vmem>>, vector<1x128xf32>
    %c0_1 = arith.constant 0 : index
    %c0_2 = arith.constant 0 : index
    %1 = vector.load %arg2[%c0_1, %c0_2] : memref<8x1xf32, #tpu.memory_space<vmem>>, vector<8x1xf32>
    %2 = vector.shape_cast %1 : vector<8x1xf32> to vector<8x1xf32>
    %3 = vector.broadcast %2 : vector<8x1xf32> to vector<8x128xf32>
    %c0_3 = arith.constant 0 : index
    %c0_4 = arith.constant 0 : index
    %4 = vector.load %arg1[%c0_3, %c0_4] : memref<8x1xf32, #tpu.memory_space<vmem>>, vector<8x1xf32>
    %5 = vector.broadcast %4 : vector<8x1xf32> to vector<8x128xf32>
    %6 = vector.broadcast %0 : vector<1x128xf32> to vector<8x128xf32>
    %7 = arith.mulf %5, %6 : vector<8x128xf32>
    %8 = arith.addf %3, %7 : vector<8x128xf32>
    %cst = arith.constant 0.000000e+00 : f32
    %9 = vector.broadcast %cst : f32 to vector<8x128xf32>
    %10 = arith.maximumf %8, %9 : vector<8x128xf32>
    %c0_5 = arith.constant 0 : index
    %c0_6 = arith.constant 0 : index
    %11 = vector.load %arg3[%c0_5, %c0_6] : memref<8x1xf32, #tpu.memory_space<vmem>>, vector<8x1xf32>
    %12 = vector.broadcast %11 : vector<8x1xf32> to vector<8x128xf32>
    %13 = arith.mulf %10, %12 : vector<8x128xf32>
    %cst_7 = arith.constant dense<0.000000e+00> : vector<128xf32>
    %14 = vector.multi_reduction <add>, %13, %cst_7 [0] : vector<8x128xf32> to vector<128xf32>
    %15 = vector.shape_cast %14 : vector<128xf32> to vector<1x128xf32>
    %c0_8 = arith.constant 0 : index
    %16 = memref.load %arg0[%c0_8] : memref<1xf32, #tpu.memory_space<smem>>
    %17 = vector.broadcast %16 : f32 to vector<1x128xf32>
    %18 = arith.addf %15, %17 : vector<1x128xf32>
    %c0_9 = arith.constant 0 : index
    %c0_10 = arith.constant 0 : index
    %19 = vector.load %arg5[%c0_9, %c0_10] : memref<1x128xf32, #tpu.memory_space<vmem>>, vector<1x128xf32>
    tpu.vector_store %arg5[%c0_9, %c0_10], %18 {strides = array<i32>} : memref<1x128xf32, #tpu.memory_space<vmem>>, vector<1x128xf32>,
    return
  }
}

</mosaic_0001>

<bundles_post_ra>
// kernel: forward.1
= control target key start
LH: loop header
LB: loop body
LE: loop exit
PB: predicated region body
PF: predicated region fallthrough
CT: control target
= control target key end

     0   :  { %11 = vsyncpa [#allocation4], 0  ;;  %s259_s0 = inlined_call_operand.<no memory space> [shape: f32[1], index: 0, kind: input, shape index: {}]   ;;  %s260_s1 = inlined_call_operand.hbm [shape: f32[8,1], index: 1, kind: input, shape index: {}]   ;;  %s261_s2 = inlined_call_operand.hbm [shape: f32[8,1], index: 2, kind: input, shape index: {}]   ;;  %s262_s3 = inlined_call_operand.vmem [shape: f32[8,1], index: 3, kind: input, shape index: {}]   ;;  %s263_s4 = inlined_call_operand.vmem [shape: f32[1,128], index: 4, kind: input, shape index: {}]   ;;  %s264_s5 = inlined_call_operand.hbm [shape: f32[1,128], index: 5, kind: output, shape index: {}]  }
   0x1   :  { %12 = vsyncpa [#allocation7], 0 }
   0x2   :  { %13 = vsyncpa [#allocation5], 0  ;;  %s180_s18 = smov [#allocation3]   ;;  %s181_s20 = smov [#allocation6]  }
   0x3   :  { %s22_s19 = sshll.u32 %s180_s18, 4  ;;  %s32_s21 = sshll.u32 %s181_s20, 4  ;;  %s23_s19 = int_to_ptr.vmem [resolvable:$true] %s22_s19  ;;  %s33_s21 = int_to_ptr.vmem [resolvable:$true] %s32_s21 }
   0x4   :  { %s108_s24 = scalar_lea.hbm %s260_s1, 128 }
   0x5   :  { %p109_p0 = scmp.ne.s32.totalorder %s260_s1, %s108_s24  ;;  %p112_p1 = scmp.lt.u32.totalorder %s108_s24, %s260_s1 }
   0x7   :  { %p114_p2 = pnand %p112_p1, %p109_p0 }
   0x9   :  { %117 = shalt.err (!%p114_p2)
}
   0xa   :  { %s118_s29 = scalar_lea.vmem %s23_s19, 128  ;;  %p123_p4 = scmp.lt.s32.totalorder %s23_s19, %s23_s19 }
   0xb   :  { %p119_p3 = scmp.ne.s32.totalorder %s23_s19, %s118_s29  ;;  %p124_p5 = scmp.lt.s32.totalorder %s118_s29, %s118_s29 }
   0xd   :  { %p125_p6 = por %p124_p5, %p123_p4 }
   0xf   :  { %p126_p7 = pnand %p125_p6, %p119_p3 }
  0x11   :  { %129 = shalt.err (!%p126_p7)
}
  0x12   :  { %25 = dma.hbm_to_vmem [thread:$0]  %s260_s1, 128, %s23_s19, [#allocation4]  }
  0x13   :  { %s130_s9 = scalar_lea.hbm %s261_s2, 128 }
  0x14   :  { %p131_p8 = scmp.ne.s32.totalorder %s261_s2, %s130_s9  ;;  %p134_p9 = scmp.lt.u32.totalorder %s130_s9, %s261_s2 }
  0x16   :  { %p136_p10 = pnand %p134_p9, %p131_p8 }
  0x18   :  { %139 = shalt.err (!%p136_p10)
}
  0x19   :  { %s140_s14 = scalar_lea.vmem %s33_s21, 128  ;;  %p145_p12 = scmp.lt.s32.totalorder %s33_s21, %s33_s21 }
  0x1a   :  { %p141_p11 = scmp.ne.s32.totalorder %s33_s21, %s140_s14  ;;  %p146_p13 = scmp.lt.s32.totalorder %s140_s14, %s140_s14 }
  0x1c   :  { %p147_p0 = por %p146_p13, %p145_p12 }
  0x1e   :  { %p148_p1 = pnand %p147_p0, %p141_p11 }
  0x20   :  { %151 = shalt.err (!%p148_p1)
}
  0x21   :  { %35 = dma.hbm_to_vmem [thread:$0]  %s261_s2, 128, %s33_s21, [#allocation7]  }
  0x22   :  { %174 = dma.done.wait [#allocation4], 128  }
  0x23   :  { %175 = vsyncadd [#allocation4], 4294967168 }
  0x24   :  { %176 = dma.done.wait [#allocation7], 128  }
  0x25   :  { %177 = vsyncadd [#allocation7], 4294967168  ;;  %v182_v0 = vmov 0   ;;  %v53_v1 = vld [vmem:[#allocation3] sm:$0xff]  ;;  %v47_v3 = vld [vmem:[#allocation6] sm:$0xff]  ;;  %v82_v17 = vstv %s259_s0  ;;  %s183_s20 = smov [#allocation8]  }
  0x26   :  { %106 = vset.pattern.permute.xlu0 %v182_v0  ;;  %107 = vset.pattern.permute.xlu1 %v182_v0  ;;  %v68_v2 = vld [vmem:[%s262_s3] sm:$0xff]  ;;  %s91_s21 = sshll.u32 %s183_s20, 4  ;;  %s92_s21 = int_to_ptr.vmem [resolvable:$true] %s91_s21 }
  0x27   :  { %56 = vperm.xlu0 %106, %v53_v1   ;;  %71 = vperm.xlu1 %107, %v68_v2   ;;  %v101_v5 = vld [vmem:[%s263_s4] ss:$0 sm:$0xff]  ;;  %s152_s4 = scalar_lea.vmem %s92_s21, 16  ;;  %s156_s22 = scalar_lea.vmem %s92_s21, 32 }
  0x28   :  { %p153_p2 = scmp.ne.s32.totalorder %s92_s21, %s152_s4  ;;  %p157_p3 = scmp.lt.s32.totalorder %s92_s21, %s92_s21 }
  0x29   :  { %p158_p4 = scmp.lt.s32.totalorder %s156_s22, %s152_s4 }
  0x2b   :  { %50 = vperm.xlu0 %106, %v47_v3   ;;  %p159_p5 = por %p158_p4, %p157_p3 }
  0x2d   :  { %p160_p6 = pnand %p159_p5, %p153_p2 }
  0xa6   :  { %v57_v4 = vpop.permute.xlu0 %56  ;;  %v72_v9 = vpop.permute.xlu1 %71 }
  0xa7   :  { %v65_v6 = vmul.f32 %v101_v5, %v57_v4 }
  0xaa   :  { %v51_v7 = vpop.permute.xlu0 %50 }
  0xab   :  { %v66_v8 = vadd.f32 %v65_v6, %v51_v7 }
  0xad   :  { %v67_v10 = vmax.f32 %v66_v8, 0.0 }
  0xaf   :  { %v74_v11 = vmul.f32 %v72_v9, %v67_v10 }
  0xb1   :  { %v75_v12 = vrot.slane %v74_v11, 4 }
  0xb3   :  { %v76_v13 = vadd.f32 %v75_v12, %v74_v11 }
  0xb5   :  { %v77_v14 = vrot.slane %v76_v13, 2 }
  0xb7   :  { %v78_v15 = vadd.f32 %v77_v14, %v76_v13 }
  0xb9   :  { %v79_v16 = vrot.slane %v78_v15, 1 }
  0xbb   :  { %v80_v18 = vadd.f32 %v79_v16, %v78_v15 }
  0xbd   :  { %v83_v19 = vadd.f32 %v82_v17, %v80_v18 }
  0xbf   :  { %84 = vst [vmem:[#allocation8] sm:$0x1] %v83_v19 }
  0xc0   :  { %163 = shalt.err (!%p160_p6)
}
  0xc1   :  { %s164_s25 = scalar_lea.hbm %s264_s5, 16 }
  0xc2   :  { %p165_p7 = scmp.ne.s32.totalorder %s264_s5, %s164_s25  ;;  %p168_p8 = scmp.lt.u32.totalorder %s164_s25, %s264_s5 }
  0xc4   :  { %p170_p9 = pnand %p168_p8, %p165_p7 }
  0xc6   :  { %173 = shalt.err (!%p170_p9)
}
  0xc7   :  { %94 = dma.vmem_to_hbm [thread:$0]  %s92_s21, 16, %s264_s5, [#allocation5]  }
  0xc8   :  { %178 = dma.done.wait [#allocation5], 16  }
  0xc9   :  { %179 = vsyncadd [#allocation5], 4294967280 }
  0xca   :  { %98 = vsyncpa [#allocation4], 1 }
  0xcb   :  { %99 = vsyncpa [#allocation7], 1 }
  0xcc   :  { %100 = vsyncpa [#allocation5], 1 }

</bundles_post_ra>
